<compile_context>
chip_gen: v7x
topology: tpu7x:2x2x1
jax: 0.10.0
libtpu: 0.0.40
codegen_flags: <defaults>
</compile_context>

<pallas_src>
import functools
import math

import jax
import jax.numpy as jnp
import numpy as np
from jax.experimental import pallas as pl
from jax.experimental.pallas import tpu as pltpu

# ---------------------------------------------------------------------------
# Model dimensions (small, consistent with the module's forward)
# ---------------------------------------------------------------------------
BATCH = 8
SEQ = 8
INPUT_DIM = 16
HIDDEN_DIM = 32
NUM_LAYERS = 2
OUTPUT_DIM = 4
BN_EPS = 1e-5
OUT_PAD = 128          # FC output padded to one full 128-lane vreg (unmasked store)


def _round8(n: int) -> int:
    return ((n + 7) // 8) * 8


def _pack_offsets(input_dim: int, hidden: int):
    """Row offsets of the packed parameter slab (all multiples of 8 sublanes)."""
    h2 = 2 * hidden
    off_wx = 0                          # (D , 8H)  layer-0 input weights (wave cols)
    off_bias = _round8(input_dim)       # (1 , 8H)  [b0 | b1] in wave cols
    off_wrec = off_bias + 8             # (2H, 8H)  [[Whh0|Wih1],[0|Whh1]] wave cols
    off_wfc = off_wrec + h2             # (2H, OUT_PAD)  BN-folded FC (zero rows for l0)
    off_bfc = off_wfc + h2              # (1 , OUT_PAD)  BN-folded FC bias
    total = off_bfc + 8
    return off_wx, off_bias, off_wrec, off_wfc, off_bfc, total


# ---------------------------------------------------------------------------
# Pallas kernel
# ---------------------------------------------------------------------------
def _make_kernel(*, seq_len: int, batch: int, input_dim: int, hidden: int,
                 out_pad: int):
    T, B, D, H = seq_len, batch, input_dim, hidden
    G8 = 8 * H
    off_wx, off_bias, off_wrec, off_wfc, off_bfc, _ = _pack_offsets(D, H)

    def kernel(x_ref, p_ref, out_ref, pre_ref):
        # ---- static, sublane-aligned slices of the single packed parameter slab ----
        w_x = p_ref[off_wx:off_wx + D, :]                       # (D, 8H)
        bias = p_ref[off_bias:off_bias + 1, :]                  # (1, 8H)
        w_rec = p_ref[off_wrec:off_wrec + 2 * H, :]             # (2H, 8H)
        w_fc = p_ref[off_wfc:off_wfc + 2 * H, 0:out_pad]        # (2H, OUT_PAD)
        b_fc = p_ref[off_bfc:off_bfc + 1, 0:out_pad]            # (1, OUT_PAD)

        # ---- hoisted input projection (off the serial chain): one MXU matmul
        #      fills the scratch with x[t]@W_ih0 + b0 in layer-0 gate columns and
        #      b1 in layer-1 gate columns, for all T*B rows at once ----
        pre_ref[...] = jnp.dot(x_ref[...], w_x,
                               preferred_element_type=jnp.float32) + bias

        # static lane masks (hoisted once; not re-built per diagonal)
        lane8 = jax.lax.broadcasted_iota(jnp.int32, (B, G8), 1)
        sig_mask = lane8 < 6 * H            # [i0|i1|f0|f1|o0|o1] -> sigmoid, [g0|g1] -> tanh
        lane2 = jax.lax.broadcasted_iota(jnp.int32, (B, 2 * H), 1)
        l0_mask = lane2 < H                 # layer-0 half of the packed state

        hcat = jnp.zeros((B, 2 * H), jnp.float32)   # [h_layer0 | h_layer1]
        ccat = jnp.zeros((B, 2 * H), jnp.float32)   # [c_layer0 | c_layer1]

        # ---- wavefront recurrence, fully unrolled (T + L - 1 = 9 diagonals;
        #      the d=0 matmul is skipped because the state is zero) ----
        for d in range(T + 1):
            t0 = min(d, T - 1)                       # clamp scratch row block
            pre = pre_ref[pl.ds(t0 * B, B), :]       # (B, 8H)
            if d > 0:
                pre = pre + jnp.dot(hcat, w_rec,
                                    preferred_element_type=jnp.float32)
            # full-vreg sigmoid + tanh combined with a static lane mask
            act = jnp.where(sig_mask, jax.nn.sigmoid(pre), jnp.tanh(pre))
            i_g = act[:, 0:2 * H]
            f_g = act[:, 2 * H:4 * H]
            o_g = act[:, 4 * H:6 * H]
            g_g = act[:, 6 * H:8 * H]
            c_new = f_g * ccat + i_g * g_g
            h_new = o_g * jnp.tanh(c_new)
            if d == 0:                # layer-1 has no valid step yet: keep its zeros
                ccat = jnp.where(l0_mask, c_new, ccat)
                hcat = jnp.where(l0_mask, h_new, hcat)
            elif d == T:              # layer-0 is finished: only layer-1 updates
                ccat = jnp.where(l0_mask, ccat, c_new)
                hcat = jnp.where(l0_mask, hcat, h_new)
            else:
                ccat, hcat = c_new, h_new

        # ---- epilogue: Dropout(eval)=identity, BN(eval) folded into FC, sigmoid.
        #      w_fc rows for the layer-0 half are zero, so this is exactly
        #      h1[T-1] @ (BN-folded W_fc) + b_fc. ----
        logits = jnp.dot(hcat, w_fc, preferred_element_type=jnp.float32) + b_fc
        out_ref[...] = jax.nn.sigmoid(logits)

    return kernel


# ---------------------------------------------------------------------------
# Host-side parameter packing (trace time)
# ---------------------------------------------------------------------------
def _to_wave_cols(w, layer: int, hidden: int):
    """Scatter a (R, 4H) matrix in PyTorch gate order [i|f|g|o] into the wave
    column order [i0|i1|f0|f1|o0|o1|g0|g1] (this layer's slots, zeros elsewhere)."""
    H = hidden
    i = w[:, 0 * H:1 * H]
    f = w[:, 1 * H:2 * H]
    g = w[:, 2 * H:3 * H]
    o = w[:, 3 * H:4 * H]
    z = jnp.zeros_like(i)
    blocks = [i, z, f, z, o, z, g, z] if layer == 0 else [z, i, z, f, z, o, z, g]
    return jnp.concatenate(blocks, axis=-1)


def _pack_params(params, input_dim: int, hidden: int, out_dim: int):
    """Build the single packed parameter slab; BN(eval) folded into the FC."""
    H = hidden
    G8 = 8 * H
    off_wx, off_bias, off_wrec, off_wfc, off_bfc, total = _pack_offsets(input_dim, H)

    w_x_wave = _to_wave_cols(params["w_ih_0"], 0, H)                        # (D, 8H)
    bias_wave = (_to_wave_cols(params["b_0"], 0, H)
                 + _to_wave_cols(params["b_1"], 1, H))                      # (1, 8H)
    w_rec_top = (_to_wave_cols(params["w_hh_0"], 0, H)
                 + _to_wave_cols(params["w_ih_1"], 1, H))                   # (H, 8H)
    w_rec_bot = _to_wave_cols(params["w_hh_1"], 1, H)                       # (H, 8H)
    w_rec = jnp.concatenate([w_rec_top, w_rec_bot], axis=0)                 # (2H, 8H)

    # Fold eval-mode BatchNorm1d (pure affine) into the FC:
    #   BN(x) = x * (gamma*rsqrt(var+eps)) + (beta - mean*gamma*rsqrt(var+eps))
    s = params["bn_gamma"] * jax.lax.rsqrt(params["bn_var"] + BN_EPS)       # (1, H)
    w_fc_bn = params["w_fc"] * s.reshape(H, 1)                              # (H, O)
    b_fc_bn = params["b_fc"] + (params["bn_beta"]
                                - params["bn_mean"] * s) @ params["w_fc"]   # (1, O)
    w_fc_wave = jnp.concatenate(
        [jnp.zeros((H, out_dim), jnp.float32), w_fc_bn], axis=0)            # (2H, O)

    def pad_to(a, rows, cols):
        return jnp.pad(a, ((0, rows - a.shape[0]), (0, cols - a.shape[1])))

    packed = jnp.concatenate([
        pad_to(w_x_wave, off_bias - off_wx, G8),
        pad_to(bias_wave, off_wrec - off_bias, G8),
        pad_to(w_rec, 2 * H, G8),
        pad_to(w_fc_wave, 2 * H, G8),
        pad_to(b_fc_bn, total - off_bfc, G8),
    ], axis=0)
    assert packed.shape == (total, G8)
    return packed


# ---------------------------------------------------------------------------
# Wrapper
# ---------------------------------------------------------------------------
@functools.partial(jax.jit, static_argnames=("hidden", "out_dim"))
def lstm_forward(x_btd, params, *, hidden, out_dim):
    """x_btd: (B, T, D) float32 — PyTorch batch_first layout."""
    B, T, D = x_btd.shape
    # time-major & flattened: row block t*B:(t+1)*B is timestep t
    x_flat = jnp.transpose(x_btd, (1, 0, 2)).reshape(T * B, D)
    packed = _pack_params(params, D, hidden, out_dim)

    vmem = pl.BlockSpec(memory_space=pltpu.MemorySpace.VMEM)
    out_full = pl.pallas_call(
        _make_kernel(seq_len=T, batch=B, input_dim=D, hidden=hidden,
                     out_pad=OUT_PAD),
        out_shape=jax.ShapeDtypeStruct((B, OUT_PAD), jnp.float32),
        in_specs=[vmem, vmem],
        out_specs=vmem,
        scratch_shapes=[
            pltpu.VMEM((T * B, 8 * hidden), jnp.float32),   # hoisted projections + biases
        ],
    )(x_flat, packed)
    return out_full[:, :out_dim]


# ---------------------------------------------------------------------------
# Deterministic parameter init (PyTorch layout: gate columns [i|f|g|o])
# ---------------------------------------------------------------------------
def init_params(key, input_dim, hidden, num_layers, out_dim):
    k = 1.0 / math.sqrt(hidden)
    H = hidden
    params = {}
    for l in range(num_layers):
        in_l = input_dim if l == 0 else hidden
        key, k1, k2, k3, k4 = jax.random.split(key, 5)
        params[f"w_ih_{l}"] = jax.random.uniform(k1, (in_l, 4 * H), jnp.float32, -k, k)
        params[f"w_hh_{l}"] = jax.random.uniform(k2, (H, 4 * H), jnp.float32, -k, k)
        b_ih = jax.random.uniform(k3, (4 * H,), jnp.float32, -k, k)
        b_hh = jax.random.uniform(k4, (4 * H,), jnp.float32, -k, k)
        params[f"b_{l}"] = (b_ih + b_hh).reshape(1, 4 * H)
    # BatchNorm1d fresh init (eval-mode running stats)
    params["bn_gamma"] = jnp.ones((1, H), jnp.float32)
    params["bn_beta"] = jnp.zeros((1, H), jnp.float32)
    params["bn_mean"] = jnp.zeros((1, H), jnp.float32)
    params["bn_var"] = jnp.ones((1, H), jnp.float32)
    # Linear(hidden, out_dim)
    key, k5, k6 = jax.random.split(key, 3)
    params["w_fc"] = jax.random.uniform(k5, (H, out_dim), jnp.float32, -k, k)
    params["b_fc"] = jax.random.uniform(k6, (1, out_dim), jnp.float32, -k, k)
    return params


# ---------------------------------------------------------------------------
# Pure-JAX f32 reference (PyTorch gate order, eval-mode dropout/BN)
# ---------------------------------------------------------------------------
def reference_forward(x_btd, params, num_layers, hidden):
    H = hidden
    B, T, D = x_btd.shape
    layer_in = x_btd
    for l in range(num_layers):
        w_ih, w_hh, b = params[f"w_ih_{l}"], params[f"w_hh_{l}"], params[f"b_{l}"]
        h = jnp.zeros((B, H), jnp.float32)
        c = jnp.zeros((B, H), jnp.float32)
        outs = []
        for t in range(T):
            pre = layer_in[:, t, :] @ w_ih + h @ w_hh + b
            i = jax.nn.sigmoid(pre[:, 0 * H:1 * H])
            f = jax.nn.sigmoid(pre[:, 1 * H:2 * H])
            g = jnp.tanh(pre[:, 2 * H:3 * H])
            o = jax.nn.sigmoid(pre[:, 3 * H:4 * H])
            c = f * c + i * g
            h = o * jnp.tanh(c)
            outs.append(h)
        layer_in = jnp.stack(outs, axis=1)
    last = layer_in[:, -1, :]
    xn = (last - params["bn_mean"]) * jax.lax.rsqrt(params["bn_var"] + BN_EPS)
    xn = xn * params["bn_gamma"] + params["bn_beta"]
    return jax.nn.sigmoid(xn @ params["w_fc"] + params["b_fc"])


# ---------------------------------------------------------------------------
if __name__ == "__main__":
    key = jax.random.PRNGKey(0)
    key, xk, pk = jax.random.split(key, 3)
    x = jax.random.normal(xk, (BATCH, SEQ, INPUT_DIM), jnp.float32)
    params = init_params(pk, INPUT_DIM, HIDDEN_DIM, NUM_LAYERS, OUTPUT_DIM)

    out = lstm_forward(x, params, hidden=HIDDEN_DIM, out_dim=OUTPUT_DIM)
    out = jax.block_until_ready(out)

    ref = reference_forward(x, params, NUM_LAYERS, HIDDEN_DIM)
    # Kernel matmuls are f32 (deliberate — addresses the bf16-accumulation concern);
    # tolerance covers the MXU's multi-pass f32 path on all chip generations.
    np.testing.assert_allclose(np.asarray(out), np.asarray(ref), rtol=1e-2, atol=1e-2)

    print("KERNEL_OK")
</pallas_src>

<mosaic_0001>
module attributes {stable_mosaic.version = 11 : i64} {
  func.func @kernel(%arg0: memref<64x16xf32, #tpu.memory_space<vmem>>, %arg1: memref<160x256xf32, #tpu.memory_space<vmem>>, %arg2: memref<8x128xf32, #tpu.memory_space<vmem>>, %arg3: memref<64x256xf32, #tpu.memory_space<vmem>>) attributes {dimension_semantics = [], scalar_prefetch = 0 : i64, scratch_operands = 1 : i64, tpu.core_type = #tpu.core_type<tc>} {
    %c0 = arith.constant 0 : index
    %c0_0 = arith.constant 0 : index
    %0 = vector.load %arg1[%c0, %c0_0] : memref<160x256xf32, #tpu.memory_space<vmem>>, vector<16x256xf32>
    %c16 = arith.constant 16 : index
    %c0_1 = arith.constant 0 : index
    %1 = vector.load %arg1[%c16, %c0_1] : memref<160x256xf32, #tpu.memory_space<vmem>>, vector<1x256xf32>
    %c24 = arith.constant 24 : index
    %c0_2 = arith.constant 0 : index
    %2 = vector.load %arg1[%c24, %c0_2] : memref<160x256xf32, #tpu.memory_space<vmem>>, vector<64x256xf32>
    %c88 = arith.constant 88 : index
    %c0_3 = arith.constant 0 : index
    %3 = vector.load %arg1[%c88, %c0_3] : memref<160x256xf32, #tpu.memory_space<vmem>>, vector<64x128xf32>
    %c152 = arith.constant 152 : index
    %c0_4 = arith.constant 0 : index
    %4 = vector.load %arg1[%c152, %c0_4] : memref<160x256xf32, #tpu.memory_space<vmem>>, vector<1x128xf32>
    %c0_5 = arith.constant 0 : index
    %c0_6 = arith.constant 0 : index
    %5 = vector.load %arg0[%c0_5, %c0_6] : memref<64x16xf32, #tpu.memory_space<vmem>>, vector<64x16xf32>
    %cst = arith.constant dense<0.000000e+00> : vector<64x256xf32>
    %6 = tpu.matmul %5, %0, %cst {dimension_numbers = #tpu.dot_dimension_numbers<[1], [0], [0], [1], [0, 0, 1, 1], [], []>} : vector<64x16xf32>, vector<16x256xf32>, vector<64x256xf32> -> vector<64x256xf32>
    %7 = vector.broadcast %1 : vector<1x256xf32> to vector<64x256xf32>
    %8 = arith.addf %6, %7 : vector<64x256xf32>
    %c0_7 = arith.constant 0 : index
    %c0_8 = arith.constant 0 : index
    %9 = vector.load %arg3[%c0_7, %c0_8] : memref<64x256xf32, #tpu.memory_space<vmem>>, vector<64x256xf32>
    tpu.vector_store %arg3[%c0_7, %c0_8], %8 {strides = array<i32>} : memref<64x256xf32, #tpu.memory_space<vmem>>, vector<64x256xf32>,
    %10 = tpu.iota {dimensions = array<i32: 1>} : vector<8x256xi32>
    %c192_i32 = arith.constant 192 : i32
    %11 = vector.broadcast %c192_i32 : i32 to vector<8x256xi32>
    %12 = arith.cmpi slt, %10, %11 : vector<8x256xi32>
    %13 = tpu.iota {dimensions = array<i32: 1>} : vector<8x64xi32>
    %c32_i32 = arith.constant 32 : i32
    %14 = vector.broadcast %c32_i32 : i32 to vector<8x64xi32>
    %15 = arith.cmpi slt, %13, %14 : vector<8x64xi32>
    %cst_9 = arith.constant 0.000000e+00 : f32
    %16 = vector.broadcast %cst_9 : f32 to vector<8x64xf32>
    %cst_10 = arith.constant 0.000000e+00 : f32
    %17 = vector.broadcast %cst_10 : f32 to vector<8x64xf32>
    %c0_11 = arith.constant 0 : index
    %c0_12 = arith.constant 0 : index
    %18 = vector.load %arg3[%c0_11, %c0_12] : memref<64x256xf32, #tpu.memory_space<vmem>>, vector<8x256xf32>
    %19 = arith.negf %18 : vector<8x256xf32>
    %20 = math.exp %19 : vector<8x256xf32>
    %cst_13 = arith.constant 1.000000e+00 : f32
    %21 = vector.broadcast %cst_13 : f32 to vector<8x256xf32>
    %22 = arith.addf %21, %20 : vector<8x256xf32>
    %23 = arith.divf %21, %22 : vector<8x256xf32>
    %24 = math.tanh %18 : vector<8x256xf32>
    %25 = arith.select %12, %23, %24 : vector<8x256xi1>, vector<8x256xf32>
    %26 = vector.extract_strided_slice %25 {offsets = [0, 0], sizes = [8, 64], strides = [1, 1]} : vector<8x256xf32> to vector<8x64xf32>
    %27 = vector.extract_strided_slice %25 {offsets = [0, 64], sizes = [8, 64], strides = [1, 1]} : vector<8x256xf32> to vector<8x64xf32>
    %28 = vector.extract_strided_slice %25 {offsets = [0, 128], sizes = [8, 64], strides = [1, 1]} : vector<8x256xf32> to vector<8x64xf32>
    %29 = vector.extract_strided_slice %25 {offsets = [0, 192], sizes = [8, 64], strides = [1, 1]} : vector<8x256xf32> to vector<8x64xf32>
    %30 = arith.mulf %27, %17 : vector<8x64xf32>
    %31 = arith.mulf %26, %29 : vector<8x64xf32>
    %32 = arith.addf %30, %31 : vector<8x64xf32>
    %33 = math.tanh %32 : vector<8x64xf32>
    %34 = arith.mulf %28, %33 : vector<8x64xf32>
    %35 = arith.select %15, %32, %17 : vector<8x64xi1>, vector<8x64xf32>
    %36 = arith.select %15, %34, %16 : vector<8x64xi1>, vector<8x64xf32>
    %c8 = arith.constant 8 : index
    %c0_14 = arith.constant 0 : index
    %37 = vector.load %arg3[%c8, %c0_14] : memref<64x256xf32, #tpu.memory_space<vmem>>, vector<8x256xf32>
    %cst_15 = arith.constant dense<0.000000e+00> : vector<8x256xf32>
    %38 = tpu.matmul %36, %2, %cst_15 {dimension_numbers = #tpu.dot_dimension_numbers<[1], [0], [0], [1], [0, 0, 1, 1], [], []>} : vector<8x64xf32>, vector<64x256xf32>, vector<8x256xf32> -> vector<8x256xf32>
    %39 = arith.addf %37, %38 : vector<8x256xf32>
    %40 = arith.negf %39 : vector<8x256xf32>
    %41 = math.exp %40 : vector<8x256xf32>
    %cst_16 = arith.constant 1.000000e+00 : f32
    %42 = vector.broadcast %cst_16 : f32 to vector<8x256xf32>
    %43 = arith.addf %42, %41 : vector<8x256xf32>
    %44 = arith.divf %42, %43 : vector<8x256xf32>
    %45 = math.tanh %39 : vector<8x256xf32>
    %46 = arith.select %12, %44, %45 : vector<8x256xi1>, vector<8x256xf32>
    %47 = vector.extract_strided_slice %46 {offsets = [0, 0], sizes = [8, 64], strides = [1, 1]} : vector<8x256xf32> to vector<8x64xf32>
    %48 = vector.extract_strided_slice %46 {offsets = [0, 64], sizes = [8, 64], strides = [1, 1]} : vector<8x256xf32> to vector<8x64xf32>
    %49 = vector.extract_strided_slice %46 {offsets = [0, 128], sizes = [8, 64], strides = [1, 1]} : vector<8x256xf32> to vector<8x64xf32>
    %50 = vector.extract_strided_slice %46 {offsets = [0, 192], sizes = [8, 64], strides = [1, 1]} : vector<8x256xf32> to vector<8x64xf32>
    %51 = arith.mulf %48, %35 : vector<8x64xf32>
    %52 = arith.mulf %47, %50 : vector<8x64xf32>
    %53 = arith.addf %51, %52 : vector<8x64xf32>
    %54 = math.tanh %53 : vector<8x64xf32>
    %55 = arith.mulf %49, %54 : vector<8x64xf32>
    %c16_17 = arith.constant 16 : index
    %c0_18 = arith.constant 0 : index
    %56 = vector.load %arg3[%c16_17, %c0_18] : memref<64x256xf32, #tpu.memory_space<vmem>>, vector<8x256xf32>
    %cst_19 = arith.constant dense<0.000000e+00> : vector<8x256xf32>
    %57 = tpu.matmul %55, %2, %cst_19 {dimension_numbers = #tpu.dot_dimension_numbers<[1], [0], [0], [1], [0, 0, 1, 1], [], []>} : vector<8x64xf32>, vector<64x256xf32>, vector<8x256xf32> -> vector<8x256xf32>
    %58 = arith.addf %56, %57 : vector<8x256xf32>
    %59 = arith.negf %58 : vector<8x256xf32>
    %60 = math.exp %59 : vector<8x256xf32>
    %cst_20 = arith.constant 1.000000e+00 : f32
    %61 = vector.broadcast %cst_20 : f32 to vector<8x256xf32>
    %62 = arith.addf %61, %60 : vector<8x256xf32>
    %63 = arith.divf %61, %62 : vector<8x256xf32>
    %64 = math.tanh %58 : vector<8x256xf32>
    %65 = arith.select %12, %63, %64 : vector<8x256xi1>, vector<8x256xf32>
    %66 = vector.extract_strided_slice %65 {offsets = [0, 0], sizes = [8, 64], strides = [1, 1]} : vector<8x256xf32> to vector<8x64xf32>
    %67 = vector.extract_strided_slice %65 {offsets = [0, 64], sizes = [8, 64], strides = [1, 1]} : vector<8x256xf32> to vector<8x64xf32>
    %68 = vector.extract_strided_slice %65 {offsets = [0, 128], sizes = [8, 64], strides = [1, 1]} : vector<8x256xf32> to vector<8x64xf32>
    %69 = vector.extract_strided_slice %65 {offsets = [0, 192], sizes = [8, 64], strides = [1, 1]} : vector<8x256xf32> to vector<8x64xf32>
    %70 = arith.mulf %67, %53 : vector<8x64xf32>
    %71 = arith.mulf %66, %69 : vector<8x64xf32>
    %72 = arith.addf %70, %71 : vector<8x64xf32>
    %73 = math.tanh %72 : vector<8x64xf32>
    %74 = arith.mulf %68, %73 : vector<8x64xf32>
    %c24_21 = arith.constant 24 : index
    %c0_22 = arith.constant 0 : index
    %75 = vector.load %arg3[%c24_21, %c0_22] : memref<64x256xf32, #tpu.memory_space<vmem>>, vector<8x256xf32>
    %cst_23 = arith.constant dense<0.000000e+00> : vector<8x256xf32>
    %76 = tpu.matmul %74, %2, %cst_23 {dimension_numbers = #tpu.dot_dimension_numbers<[1], [0], [0], [1], [0, 0, 1, 1], [], []>} : vector<8x64xf32>, vector<64x256xf32>, vector<8x256xf32> -> vector<8x256xf32>
    %77 = arith.addf %75, %76 : vector<8x256xf32>
    %78 = arith.negf %77 : vector<8x256xf32>
    %79 = math.exp %78 : vector<8x256xf32>
    %cst_24 = arith.constant 1.000000e+00 : f32
    %80 = vector.broadcast %cst_24 : f32 to vector<8x256xf32>
    %81 = arith.addf %80, %79 : vector<8x256xf32>
    %82 = arith.divf %80, %81 : vector<8x256xf32>
    %83 = math.tanh %77 : vector<8x256xf32>
    %84 = arith.select %12, %82, %83 : vector<8x256xi1>, vector<8x256xf32>
    %85 = vector.extract_strided_slice %84 {offsets = [0, 0], sizes = [8, 64], strides = [1, 1]} : vector<8x256xf32> to vector<8x64xf32>
    %86 = vector.extract_strided_slice %84 {offsets = [0, 64], sizes = [8, 64], strides = [1, 1]} : vector<8x256xf32> to vector<8x64xf32>
    %87 = vector.extract_strided_slice %84 {offsets = [0, 128], sizes = [8, 64], strides = [1, 1]} : vector<8x256xf32> to vector<8x64xf32>
    %88 = vector.extract_strided_slice %84 {offsets = [0, 192], sizes = [8, 64], strides = [1, 1]} : vector<8x256xf32> to vector<8x64xf32>
    %89 = arith.mulf %86, %72 : vector<8x64xf32>
    %90 = arith.mulf %85, %88 : vector<8x64xf32>
    %91 = arith.addf %89, %90 : vector<8x64xf32>
    %92 = math.tanh %91 : vector<8x64xf32>
    %93 = arith.mulf %87, %92 : vector<8x64xf32>
    %c32 = arith.constant 32 : index
    %c0_25 = arith.constant 0 : index
    %94 = vector.load %arg3[%c32, %c0_25] : memref<64x256xf32, #tpu.memory_space<vmem>>, vector<8x256xf32>
    %cst_26 = arith.constant dense<0.000000e+00> : vector<8x256xf32>
    %95 = tpu.matmul %93, %2, %cst_26 {dimension_numbers = #tpu.dot_dimension_numbers<[1], [0], [0], [1], [0, 0, 1, 1], [], []>} : vector<8x64xf32>, vector<64x256xf32>, vector<8x256xf32> -> vector<8x256xf32>
    %96 = arith.addf %94, %95 : vector<8x256xf32>
    %97 = arith.negf %96 : vector<8x256xf32>
    %98 = math.exp %97 : vector<8x256xf32>
    %cst_27 = arith.constant 1.000000e+00 : f32
    %99 = vector.broadcast %cst_27 : f32 to vector<8x256xf32>
    %100 = arith.addf %99, %98 : vector<8x256xf32>
    %101 = arith.divf %99, %100 : vector<8x256xf32>
    %102 = math.tanh %96 : vector<8x256xf32>
    %103 = arith.select %12, %101, %102 : vector<8x256xi1>, vector<8x256xf32>
    %104 = vector.extract_strided_slice %103 {offsets = [0, 0], sizes = [8, 64], strides = [1, 1]} : vector<8x256xf32> to vector<8x64xf32>
    %105 = vector.extract_strided_slice %103 {offsets = [0, 64], sizes = [8, 64], strides = [1, 1]} : vector<8x256xf32> to vector<8x64xf32>
    %106 = vector.extract_strided_slice %103 {offsets = [0, 128], sizes = [8, 64], strides = [1, 1]} : vector<8x256xf32> to vector<8x64xf32>
    %107 = vector.extract_strided_slice %103 {offsets = [0, 192], sizes = [8, 64], strides = [1, 1]} : vector<8x256xf32> to vector<8x64xf32>
    %108 = arith.mulf %105, %91 : vector<8x64xf32>
    %109 = arith.mulf %104, %107 : vector<8x64xf32>
    %110 = arith.addf %108, %109 : vector<8x64xf32>
    %111 = math.tanh %110 : vector<8x64xf32>
    %112 = arith.mulf %106, %111 : vector<8x64xf32>
    %c40 = arith.constant 40 : index
    %c0_28 = arith.constant 0 : index
    %113 = vector.load %arg3[%c40, %c0_28] : memref<64x256xf32, #tpu.memory_space<vmem>>, vector<8x256xf32>
    %cst_29 = arith.constant dense<0.000000e+00> : vector<8x256xf32>
    %114 = tpu.matmul %112, %2, %cst_29 {dimension_numbers = #tpu.dot_dimension_numbers<[1], [0], [0], [1], [0, 0, 1, 1], [], []>} : vector<8x64xf32>, vector<64x256xf32>, vector<8x256xf32> -> vector<8x256xf32>
    %115 = arith.addf %113, %114 : vector<8x256xf32>
    %116 = arith.negf %115 : vector<8x256xf32>
    %117 = math.exp %116 : vector<8x256xf32>
    %cst_30 = arith.constant 1.000000e+00 : f32
    %118 = vector.broadcast %cst_30 : f32 to vector<8x256xf32>
    %119 = arith.addf %118, %117 : vector<8x256xf32>
    %120 = arith.divf %118, %119 : vector<8x256xf32>
    %121 = math.tanh %115 : vector<8x256xf32>
    %122 = arith.select %12, %120, %121 : vector<8x256xi1>, vector<8x256xf32>
    %123 = vector.extract_strided_slice %122 {offsets = [0, 0], sizes = [8, 64], strides = [1, 1]} : vector<8x256xf32> to vector<8x64xf32>
    %124 = vector.extract_strided_slice %122 {offsets = [0, 64], sizes = [8, 64], strides = [1, 1]} : vector<8x256xf32> to vector<8x64xf32>
    %125 = vector.extract_strided_slice %122 {offsets = [0, 128], sizes = [8, 64], strides = [1, 1]} : vector<8x256xf32> to vector<8x64xf32>
    %126 = vector.extract_strided_slice %122 {offsets = [0, 192], sizes = [8, 64], strides = [1, 1]} : vector<8x256xf32> to vector<8x64xf32>
    %127 = arith.mulf %124, %110 : vector<8x64xf32>
    %128 = arith.mulf %123, %126 : vector<8x64xf32>
    %129 = arith.addf %127, %128 : vector<8x64xf32>
    %130 = math.tanh %129 : vector<8x64xf32>
    %131 = arith.mulf %125, %130 : vector<8x64xf32>
    %c48 = arith.constant 48 : index
    %c0_31 = arith.constant 0 : index
    %132 = vector.load %arg3[%c48, %c0_31] : memref<64x256xf32, #tpu.memory_space<vmem>>, vector<8x256xf32>
    %cst_32 = arith.constant dense<0.000000e+00> : vector<8x256xf32>
    %133 = tpu.matmul %131, %2, %cst_32 {dimension_numbers = #tpu.dot_dimension_numbers<[1], [0], [0], [1], [0, 0, 1, 1], [], []>} : vector<8x64xf32>, vector<64x256xf32>, vector<8x256xf32> -> vector<8x256xf32>
    %134 = arith.addf %132, %133 : vector<8x256xf32>
    %135 = arith.negf %134 : vector<8x256xf32>
    %136 = math.exp %135 : vector<8x256xf32>
    %cst_33 = arith.constant 1.000000e+00 : f32
    %137 = vector.broadcast %cst_33 : f32 to vector<8x256xf32>
    %138 = arith.addf %137, %136 : vector<8x256xf32>
    %139 = arith.divf %137, %138 : vector<8x256xf32>
    %140 = math.tanh %134 : vector<8x256xf32>
    %141 = arith.select %12, %139, %140 : vector<8x256xi1>, vector<8x256xf32>
    %142 = vector.extract_strided_slice %141 {offsets = [0, 0], sizes = [8, 64], strides = [1, 1]} : vector<8x256xf32> to vector<8x64xf32>
    %143 = vector.extract_strided_slice %141 {offsets = [0, 64], sizes = [8, 64], strides = [1, 1]} : vector<8x256xf32> to vector<8x64xf32>
    %144 = vector.extract_strided_slice %141 {offsets = [0, 128], sizes = [8, 64], strides = [1, 1]} : vector<8x256xf32> to vector<8x64xf32>
    %145 = vector.extract_strided_slice %141 {offsets = [0, 192], sizes = [8, 64], strides = [1, 1]} : vector<8x256xf32> to vector<8x64xf32>
    %146 = arith.mulf %143, %129 : vector<8x64xf32>
    %147 = arith.mulf %142, %145 : vector<8x64xf32>
    %148 = arith.addf %146, %147 : vector<8x64xf32>
    %149 = math.tanh %148 : vector<8x64xf32>
    %150 = arith.mulf %144, %149 : vector<8x64xf32>
    %c56 = arith.constant 56 : index
    %c0_34 = arith.constant 0 : index
    %151 = vector.load %arg3[%c56, %c0_34] : memref<64x256xf32, #tpu.memory_space<vmem>>, vector<8x256xf32>
    %cst_35 = arith.constant dense<0.000000e+00> : vector<8x256xf32>
    %152 = tpu.matmul %150, %2, %cst_35 {dimension_numbers = #tpu.dot_dimension_numbers<[1], [0], [0], [1], [0, 0, 1, 1], [], []>} : vector<8x64xf32>, vector<64x256xf32>, vector<8x256xf32> -> vector<8x256xf32>
    %153 = arith.addf %151, %152 : vector<8x256xf32>
    %154 = arith.negf %153 : vector<8x256xf32>
    %155 = math.exp %154 : vector<8x256xf32>
    %cst_36 = arith.constant 1.000000e+00 : f32
    %156 = vector.broadcast %cst_36 : f32 to vector<8x256xf32>
    %157 = arith.addf %156, %155 : vector<8x256xf32>
    %158 = arith.divf %156, %157 : vector<8x256xf32>
    %159 = math.tanh %153 : vector<8x256xf32>
    %160 = arith.select %12, %158, %159 : vector<8x256xi1>, vector<8x256xf32>
    %161 = vector.extract_strided_slice %160 {offsets = [0, 0], sizes = [8, 64], strides = [1, 1]} : vector<8x256xf32> to vector<8x64xf32>
    %162 = vector.extract_strided_slice %160 {offsets = [0, 64], sizes = [8, 64], strides = [1, 1]} : vector<8x256xf32> to vector<8x64xf32>
    %163 = vector.extract_strided_slice %160 {offsets = [0, 128], sizes = [8, 64], strides = [1, 1]} : vector<8x256xf32> to vector<8x64xf32>
    %164 = vector.extract_strided_slice %160 {offsets = [0, 192], sizes = [8, 64], strides = [1, 1]} : vector<8x256xf32> to vector<8x64xf32>
    %165 = arith.mulf %162, %148 : vector<8x64xf32>
    %166 = arith.mulf %161, %164 : vector<8x64xf32>
    %167 = arith.addf %165, %166 : vector<8x64xf32>
    %168 = math.tanh %167 : vector<8x64xf32>
    %169 = arith.mulf %163, %168 : vector<8x64xf32>
    %c56_37 = arith.constant 56 : index
    %c0_38 = arith.constant 0 : index
    %170 = vector.load %arg3[%c56_37, %c0_38] : memref<64x256xf32, #tpu.memory_space<vmem>>, vector<8x256xf32>
    %cst_39 = arith.constant dense<0.000000e+00> : vector<8x256xf32>
    %171 = tpu.matmul %169, %2, %cst_39 {dimension_numbers = #tpu.dot_dimension_numbers<[1], [0], [0], [1], [0, 0, 1, 1], [], []>} : vector<8x64xf32>, vector<64x256xf32>, vector<8x256xf32> -> vector<8x256xf32>
    %172 = arith.addf %170, %171 : vector<8x256xf32>
    %173 = arith.negf %172 : vector<8x256xf32>
    %174 = math.exp %173 : vector<8x256xf32>
    %cst_40 = arith.constant 1.000000e+00 : f32
    %175 = vector.broadcast %cst_40 : f32 to vector<8x256xf32>
    %176 = arith.addf %175, %174 : vector<8x256xf32>
    %177 = arith.divf %175, %176 : vector<8x256xf32>
    %178 = math.tanh %172 : vector<8x256xf32>
    %179 = arith.select %12, %177, %178 : vector<8x256xi1>, vector<8x256xf32>
    %180 = vector.extract_strided_slice %179 {offsets = [0, 0], sizes = [8, 64], strides = [1, 1]} : vector<8x256xf32> to vector<8x64xf32>
    %181 = vector.extract_strided_slice %179 {offsets = [0, 64], sizes = [8, 64], strides = [1, 1]} : vector<8x256xf32> to vector<8x64xf32>
    %182 = vector.extract_strided_slice %179 {offsets = [0, 128], sizes = [8, 64], strides = [1, 1]} : vector<8x256xf32> to vector<8x64xf32>
    %183 = vector.extract_strided_slice %179 {offsets = [0, 192], sizes = [8, 64], strides = [1, 1]} : vector<8x256xf32> to vector<8x64xf32>
    %184 = arith.mulf %181, %167 : vector<8x64xf32>
    %185 = arith.mulf %180, %183 : vector<8x64xf32>
    %186 = arith.addf %184, %185 : vector<8x64xf32>
    %187 = math.tanh %186 : vector<8x64xf32>
    %188 = arith.mulf %182, %187 : vector<8x64xf32>
    %189 = arith.select %15, %169, %188 : vector<8x64xi1>, vector<8x64xf32>
    %cst_41 = arith.constant dense<0.000000e+00> : vector<8x128xf32>
    %190 = tpu.matmul %189, %3, %cst_41 {dimension_numbers = #tpu.dot_dimension_numbers<[1], [0], [0], [1], [0, 0, 1, 1], [], []>} : vector<8x64xf32>, vector<64x128xf32>, vector<8x128xf32> -> vector<8x128xf32>
    %191 = vector.broadcast %4 : vector<1x128xf32> to vector<8x128xf32>
    %192 = arith.addf %190, %191 : vector<8x128xf32>
    %193 = arith.negf %192 : vector<8x128xf32>
    %194 = math.exp %193 : vector<8x128xf32>
    %cst_42 = arith.constant 1.000000e+00 : f32
    %195 = vector.broadcast %cst_42 : f32 to vector<8x128xf32>
    %196 = arith.addf %195, %194 : vector<8x128xf32>
    %197 = arith.divf %195, %196 : vector<8x128xf32>
    %c0_43 = arith.constant 0 : index
    %c0_44 = arith.constant 0 : index
    %198 = vector.load %arg2[%c0_43, %c0_44] : memref<8x128xf32, #tpu.memory_space<vmem>>, vector<8x128xf32>
    tpu.vector_store %arg2[%c0_43, %c0_44], %197 {strides = array<i32>} : memref<8x128xf32, #tpu.memory_space<vmem>>, vector<8x128xf32>,
    return
  }
}

</mosaic_0001>

<bundles_post_ra>
// kernel: lstm_forward.1
= control target key start
LH: loop header
LB: loop body
LE: loop exit
PB: predicated region body
PF: predicated region fallthrough
CT: control target
= control target key end

     0   :  { %v1587_v3 = vmov 0.0   ;;  %vm61_vm0 = vcmask 130048   ;;  %v51_v8 = vlaneseq  ;;  %s1588_s21 = smov 64   ;;  %vm264_vm3 = vcmask 523264   ;;  %s1961_s1 = inlined_call_operand.vmem [shape: f32[160,256], index: 1, kind: input, shape index: {}]   ;;  %s1962_s0 = inlined_call_operand.vmem [shape: f32[64,16], index: 0, kind: input, shape index: {}]   ;;  %s1963_s2 = inlined_call_operand.vmem [shape: f32[8,128], index: 2, kind: output, shape index: {}]  }
   0x1   :  { %v12_v0 = vld [vmem:[%s1961_s1 + $0x8] sm:$0xff]  ;;  %v14_v1 = vld [vmem:[%s1961_s1 + $0x18] sm:$0xff]  ;;  %v11_v2 = vld [vmem:[%s1961_s1] sm:$0xff]  ;;  %150 = vmatprep.mubr.f32.mxu1 %v1587_v3  ;;  %447 = vmatprep.mubr.f32.mxu0 %v1587_v3  ;;  %vm1590_vm4 = vmmov 0  }
   0x2   :  { %v1303_v4 = vpack.c.bf16 %v14_v1, %v12_v0  ;;  %v13_v5 = vld [vmem:[%s1961_s1 + $0x10] sm:$0xff]  ;;  %v42_v7 = vld [vmem:[%s1962_s0] sm:$0xff]  ;;  %v52_v9 = vshrl.u32 %v51_v8, 7  ;;  %v1631_v19 = vand.u32 127, %v51_v8  ;;  %v18_v33 = vld [vmem:[%s1961_s1 + $0x38] sm:$0xff] }
   0x3   :  { %v1305_v6 = vpack.c.bf16 %v13_v5, %v11_v2  ;;  %v1238_v11 = vld [vmem:[%s1961_s1 + $0x20] ss:$8 sm:$0x3]  ;;  %v17_v35 = vld [vmem:[%s1961_s1 + $0x30] sm:$0xff]  ;;  %v22_v40 = vld [vmem:[%s1961_s1 + $0x58] sm:$0xff] }
   0x4   :  { %1304 = vmatprep.subr.bf16.mxu1 %v1303_v4  ;;  %v57_v10 = vsub.s32 1, %v52_v9  ;;  %v1634_v20 = vadd.s32 128, %v1631_v19  ;;  %v53_v24 = vsub.s32 0, %v52_v9  ;;  %v20_v34 = vld [vmem:[%s1961_s1 + $0x48] sm:$0xff]  ;;  %v19_v37 = vld [vmem:[%s1961_s1 + $0x40] sm:$0xff]  ;;  %v21_v42 = vld [vmem:[%s1961_s1 + $0x50] sm:$0xff] }
   0x5   :  { %1306 = vmatpush1.bf16.msra.mxu1 %v1305_v6  ;;  %v1659_v36 = vpack.c.bf16 %v20_v34, %v18_v33  ;;  %v43_v38 = vld [vmem:[%s1962_s0 + $0x8] sm:$0xff]  ;;  %v1667_v39 = vpack.c.bf16 %v19_v37, %v17_v35  ;;  %v44_v43 = vld [vmem:[%s1962_s0 + $0x10] sm:$0xff]  ;;  %v23_v45 = vld [vmem:[%s1961_s1 + $0x60] sm:$0xff]  ;;  %vm220_vm2 = vcmp.lt.s32.totalorder %v1631_v19, 32 }
   0x6   :  { %v1628_v12 = vrot.slane %v1238_v11, %v57_v10  ;;  %vm219_vm1 = vcmp.lt.s32.totalorder %v1634_v20, 192  ;;  %v1643_v25 = vrot.slane %v1238_v11, %v53_v24  ;;  %v24_v41 = vld [vmem:[%s1961_s1 + $0x68] sm:$0xff]  ;;  %v1690_v46 = vpack.c.bf16 %v23_v45, %v21_v42  ;;  %v26_v47 = vld [vmem:[%s1961_s1 + $0x78] sm:$0xff]  ;;  %v25_v50 = vld [vmem:[%s1961_s1 + $0x70] sm:$0xff] }
   0x7   :  { %1308 = vmatprep.subr.bf16.mxu1 %v1659_v36  ;;  %v1684_v44 = vpack.c.bf16 %v24_v41, %v22_v40  ;;  %v28_v48 = vld [vmem:[%s1961_s1 + $0x88] sm:$0xff]  ;;  %1324 = vmatprep.subr.bf16.mxu0 %v1659_v36  ;;  %v27_v51 = vld [vmem:[%s1961_s1 + $0x80] sm:$0xff]  ;;  %v30_v52 = vld [vmem:[%s1961_s1 + $0x98] sm:$0xff] }
   0x8   :  { %1239 = vmatmul.mubr.msk.f32.vlgmr.msra.gmra.mrb[0].mxu1 %vm61_vm0, %v42_v7  ;;  %v1700_v49 = vpack.c.bf16 %v28_v48, %v26_v47  ;;  %1326 = vmatpush1.bf16.msra.mxu0 %v1667_v39  ;;  %v32_v53 = vld [vmem:[%s1961_s1 + $0xa8] sm:$0xff]  ;;  %v45_v54 = vld [vmem:[%s1962_s0 + $0x18] sm:$0xff]  ;;  %v1722_v55 = vpack.c.bf16 %v27_v51, %v25_v50  ;;  %v29_v57 = vld [vmem:[%s1961_s1 + $0x90] sm:$0xff] }
   0x9   :  { %156 = vmatprep.mubr.f32.mxu1 %v1587_v3  ;;  %1310 = vmatpush1.bf16.msra.mxu1 %v1667_v39  ;;  %v1725_v56 = vpack.c.bf16 %v32_v53, %v30_v52  ;;  %v31_v58 = vld [vmem:[%s1961_s1 + $0xa0] sm:$0xff]  ;;  %v47_v61 = vld [vmem:[%s1962_s0 + $0x28] sm:$0xff]  ;;  %v48_v62 = vld [vmem:[%s1962_s0 + $0x30] sm:$0xff] }
   0xa   :  { %1312 = vmatprep.subr.bf16.mxu1 %v1684_v44  ;;  %1328 = vmatprep.subr.bf16.mxu0 %v1684_v44  ;;  %v46_v59 = vld [vmem:[%s1962_s0 + $0x20] sm:$0xff]  ;;  %v1741_v60 = vpack.c.bf16 %v31_v58, %v29_v57  ;;  %v49_v63 = vld [vmem:[%s1962_s0 + $0x38] sm:$0xff] }
   0xb   :  { %v34_v20 = vld [vmem:[%s1961_s1 + $0xc0] sm:$0xff] }
   0xc   :  { %1240 = vmatmul.mubr.msk.f32.gmra.mrb[2].mxu1 %vm61_vm0, %v43_v38  ;;  %1330 = vmatpush1.bf16.msra.mxu0 %v1690_v46 }
   0xd   :  { %162 = vmatprep.mubr.f32.mxu1 %v1587_v3  ;;  %1314 = vmatpush1.bf16.msra.mxu1 %v1690_v46 }
   0xe   :  { %1316 = vmatprep.subr.bf16.mxu1 %v1700_v49  ;;  %1332 = vmatprep.subr.bf16.mxu0 %v1700_v49 }
  0x10   :  { %1241 = vmatmul.mubr.msk.f32.gmra.mrb[4].mxu1 %vm61_vm0, %v44_v43  ;;  %1334 = vmatpush1.bf16.msra.mxu0 %v1722_v55 }
  0x11   :  { %168 = vmatprep.mubr.f32.mxu1 %v1587_v3  ;;  %1318 = vmatpush1.bf16.msra.mxu1 %v1722_v55 }
  0x12   :  { %1320 = vmatprep.subr.bf16.mxu1 %v1725_v56  ;;  %1336 = vmatprep.subr.bf16.mxu0 %v1725_v56 }
  0x14   :  { %1242 = vmatmul.mubr.msk.f32.gmra.mrb[6].mxu1 %vm61_vm0, %v45_v54  ;;  %1338 = vmatpush1.bf16.msra.mxu0 %v1741_v60 }
  0x15   :  { %174 = vmatprep.mubr.f32.mxu1 %v1587_v3  ;;  %1322 = vmatpush1.bf16.msra.mxu1 %v1741_v60 }
  0x16   :  { %1404 = vmatprep.subr.bf16.mxu1 %v1659_v36  ;;  %1340 = vmatprep.subr.bf16.mxu0 %v1659_v36 }
  0x18   :  { %1243 = vmatmul.mubr.msk.f32.gmra.mrb[8].mxu1 %vm61_vm0, %v46_v59 }
  0x19   :  { %180 = vmatprep.mubr.f32.mxu1 %v1587_v3 }
  0x1c   :  { %1244 = vmatmul.mubr.msk.f32.gmra.mrb[10].mxu1 %vm61_vm0, %v47_v61 }
  0x1d   :  { %186 = vmatprep.mubr.f32.mxu1 %v1587_v3 }
  0x20   :  { %1245 = vmatmul.mubr.msk.f32.gmra.mrb[12].mxu1 %vm61_vm0, %v48_v62 }
  0x21   :  { %192 = vmatprep.mubr.f32.mxu1 %v1587_v3 }
  0x24   :  { %1246 = vmatmul.mubr.msk.f32.gmra.mrb[14].mxu1 %vm61_vm0, %v49_v63 }
  0x25   :  { %332 = vmatprep.mubr.f32.mxu1 %v1587_v3 }
  0xdb   :  { %v152_v13 = vpop.f32.mrb[0].mxu1 }
  0xdc   :  { %v154_v14 = vpop.f32.mrb[1].mxu1  ;;  %v153_v26 = vadd.f32 %v152_v13, %v1643_v25 }
  0xdd   :  { %v155_v15 = vadd.f32 %v154_v14, %v1628_v12 }
  0xde   :  { %v1247_v27 = vmul.f32 -1.442695, %v153_v26 }
  0xdf   :  { %v1248_v16 = vmul.f32 -1.442695, %v155_v15 }
  0xe1   :  { %1475 = vpow2.f32 %v1248_v16 }
  0xe2   :  { %1477 = vtanh.f32 %v155_v15 }
  0xe3   :  { %v1770_v5 = vpop.f32.mrb[4].mxu1 }
  0xe4   :  { %v1772_v6 = vpop.f32.mrb[5].mxu1  ;;  %v165_v54 = vadd.f32 %v1770_v5, %v1643_v25 }
  0xe5   :  { %v167_v57 = vadd.f32 %v1772_v6, %v1628_v12 }
  0xe7   :  { %v1774_v7 = vpop.f32.mrb[6].mxu1 }
  0xe8   :  { %v1776_v8 = vpop.f32.mrb[7].mxu1 }
  0xeb   :  { %v1476_v17 = vpop.eup %1475  ;;  %v1778_v9 = vpop.f32.mrb[8].mxu1 }
  0xec   :  { %v230_v18 = vadd.f32 1.0, %v1476_v17  ;;  %v1478_v21 = vpop.eup %1477  ;;  %v1780_v10 = vpop.f32.mrb[9].mxu1 }
  0xee   :  { %1479 = vrcp.f32 %v230_v18 }
  0xef   :  { %1481 = vpow2.f32 %v1247_v27  ;;  %v1782_v11 = vpop.f32.mrb[10].mxu1 }
  0xf0   :  { %v1784_v13 = vpop.f32.mrb[11].mxu1 }
  0xf3   :  { %v1787_v15 = vpop.f32.mrb[12].mxu1 }
  0xf4   :  { %v1790_v17 = vpop.f32.mrb[13].mxu1 }
  0xf7   :  { %v1792_v18 = vpop.f32.mrb[14].mxu1 }
  0xf8   :  { %v1480_v22 = vpop.eup %1479 }
  0xf9   :  { %v1639_v23 = vsel %vm219_vm1, %v1480_v22, %v1478_v21  ;;  %v1482_v28 = vpop.eup %1481  ;;  %v1796_v22 = vpop.f32.mrb[15].mxu1 }
  0xfa   :  { %241 = vrot.lane.b32.xlu0 %v1639_v23, %s1588_s21  ;;  %v229_v29 = vadd.f32 1.0, %v1482_v28 }
  0xfc   :  { %1483 = vrcp.f32 %v229_v29 }
 0x106   :  { %v1646_v30 = vpop.eup %1483 }
 0x107   :  { %v239_v0 = vmul.f32 0.0, %v1646_v30 }
 0x16c   :  { %v242_v31 = vpop.permute.xlu0 %241 }
 0x16d   :  { %v244_v32 = vmul.f32 %v1646_v30, %v242_v31 }
 0x16f   :  { %246 = vrot.lane.b32.xlu0 %v244_v32, %s1588_s21 }
 0x1e1   :  { %v247_v1 = vpop.permute.xlu0 %246 }
 0x1e2   :  { %v249_v2 = vadd.f32 %v247_v1, %v239_v0 }
 0x1e4   :  { %1485 = vtanh.f32 %v249_v2 }
 0x1ee   :  { %v1486_v4 = vpop.eup %1485 }
 0x1ef   :  { %252 = vrot.lane.b32.xlu1 %v1486_v4, %s1588_s21 }
 0x1f3   :  { %257 = vrot.lane.b32.xlu1 %v249_v2, %s1588_s21 }
 0x261   :  { %v253_v14 = vpop.permute.xlu1 %252 }
 0x262   :  { %v255_v16 = vmul.f32 %v253_v14, %v1639_v23 }
 0x264   :  { %v261_v21 = vsel %vm220_vm2, %v255_v16, 0.0 }
 0x265   :  { %1249 = vmatmul.mubr.msk.f32.vlgmr.msra.gmra.mrb[2].mxu1 %vm264_vm3, %v261_v21  ;;  %v258_v24 = vpop.permute.xlu1 %257 }
 0x266   :  { %v260_v26 = vsel %vm220_vm2, %v258_v24, 0.0  ;;  %1406 = vmatpush1.bf16.msra.mxu1 %v1667_v39  ;;  %1002 = vmatprep.mubr.f32.mxu1 %v1587_v3 }
 0x267   :  { %358 = vrot.lane.b32.xlu1 %v260_v26, %s1588_s21  ;;  %1408 = vmatprep.subr.bf16.mxu1 %v1684_v44 }
 0x26a   :  { %1410 = vmatpush1.bf16.msra.mxu1 %v1690_v46 }
 0x26b   :  { %1412 = vmatprep.subr.bf16.mxu1 %v1700_v49 }
 0x26e   :  { %1414 = vmatpush1.bf16.msra.mxu1 %v1722_v55 }
 0x26f   :  { %1416 = vmatprep.subr.bf16.mxu1 %v1725_v56 }
 0x272   :  { %1418 = vmatpush1.bf16.msra.mxu1 %v1741_v60 }
 0x273   :  { %1420 = vmatprep.subr.bf16.mxu1 %v1659_v36 }
 0x2d9   :  { %v359_v45 = vpop.permute.xlu1 %358 }
 0x338   :  { %v334_v23 = vpop.f32.mrb[2].mxu1 }
 0x339   :  { %v336_v27 = vpop.f32.mrb[3].mxu1  ;;  %v1447_v35 = vadd.f32 %v334_v23, %v1643_v25 }
 0x33a   :  { %v1448_v28 = vadd.f32 %v336_v27, %v1628_v12 }
 0x33b   :  { %v1250_v37 = vmul.f32 -1.442695, %v1447_v35 }
 0x33c   :  { %v1251_v29 = vmul.f32 -1.442695, %v1448_v28 }
 0x33e   :  { %1487 = vpow2.f32 %v1251_v29 }
 0x33f   :  { %1489 = vtanh.f32 %v1448_v28 }
 0x348   :  { %v1488_v30 = vpop.eup %1487 }
 0x349   :  { %v348_v31 = vadd.f32 1.0, %v1488_v30  ;;  %v1490_v32 = vpop.eup %1489 }
 0x34b   :  { %1491 = vrcp.f32 %v348_v31 }
 0x34c   :  { %1493 = vpow2.f32 %v1250_v37 }
 0x355   :  { %v1492_v33 = vpop.eup %1491 }
 0x356   :  { %v356_v34 = vsel %vm219_vm1, %v1492_v33, %v1490_v32  ;;  %v1494_v38 = vpop.eup %1493  ;;  %v171_v32 = vadd.f32 %v1774_v7, %v1643_v25  ;;  %v173_v33 = vadd.f32 %v1776_v8, %v1628_v12 }
 0x357   :  { %363 = vrot.lane.b32.xlu0 %v356_v34, %s1588_s21  ;;  %v347_v40 = vadd.f32 1.0, %v1494_v38 }
 0x359   :  { %1495 = vrcp.f32 %v347_v40 }
 0x363   :  { %v1496_v41 = vpop.eup %1495 }
 0x364   :  { %v361_v47 = vmul.f32 %v1496_v41, %v359_v45 }
 0x3c9   :  { %v364_v42 = vpop.permute.xlu0 %363 }
 0x3ca   :  { %v366_v43 = vmul.f32 %v1496_v41, %v364_v42 }
 0x3cc   :  { %368 = vrot.lane.b32.xlu0 %v366_v43, %s1588_s21 }
 0x43e   :  { %v369_v48 = vpop.permute.xlu0 %368 }
 0x43f   :  { %v371_v50 = vadd.f32 %v369_v48, %v361_v47 }
 0x441   :  { %1497 = vtanh.f32 %v371_v50 }
 0x44b   :  { %v1498_v51 = vpop.eup %1497 }
 0x44c   :  { %374 = vrot.lane.b32.xlu1 %v1498_v51, %s1588_s21 }
 0x4be   :  { %v375_v52 = vpop.permute.xlu1 %374 }
 0x4bf   :  { %v377_v53 = vmul.f32 %v375_v52, %v356_v34 }
 0x4c1   :  { %1252 = vmatmul.mubr.msk.f32.vlgmr.msra.gmra.mrb[0].mxu0 %vm264_vm3, %v377_v53 }
 0x4c2   :  { %1342 = vmatpush1.bf16.msra.mxu0 %v1667_v39  ;;  %558 = vmatprep.mubr.f32.mxu0 %v1587_v3 }
 0x4c3   :  { %1344 = vmatprep.subr.bf16.mxu0 %v1684_v44 }
 0x4c6   :  { %1346 = vmatpush1.bf16.msra.mxu0 %v1690_v46 }
 0x4c7   :  { %1348 = vmatprep.subr.bf16.mxu0 %v1700_v49 }
 0x4ca   :  { %1350 = vmatpush1.bf16.msra.mxu0 %v1722_v55 }
 0x4cb   :  { %1352 = vmatprep.subr.bf16.mxu0 %v1725_v56 }
 0x4ce   :  { %1354 = vmatpush1.bf16.msra.mxu0 %v1741_v60 }
 0x4cf   :  { %1356 = vmatprep.subr.bf16.mxu0 %v1659_v36 }
 0x594   :  { %v449_v58 = vpop.f32.mrb[0].mxu0 }
 0x595   :  { %v454_v59 = vadd.f32 %v449_v58, %v165_v54  ;;  %v451_v61 = vpop.f32.mrb[1].mxu0 }
 0x596   :  { %v455_v62 = vadd.f32 %v451_v61, %v167_v57 }
 0x597   :  { %v1253_v5 = vmul.f32 -1.442695, %v454_v59 }
 0x598   :  { %v1254_v63 = vmul.f32 -1.442695, %v455_v62 }
 0x59a   :  { %1499 = vpow2.f32 %v1254_v63  ;;  %v179_v63 = vadd.f32 %v1780_v10, %v1628_v12 }
 0x59b   :  { %1501 = vtanh.f32 %v455_v62  ;;  %v177_v62 = vadd.f32 %v1778_v9, %v1643_v25 }
 0x5a4   :  { %v1500_v0 = vpop.eup %1499 }
 0x5a5   :  { %v463_v1 = vadd.f32 1.0, %v1500_v0  ;;  %v1502_v2 = vpop.eup %1501 }
 0x5a7   :  { %1503 = vrcp.f32 %v463_v1 }
 0x5a8   :  { %1505 = vpow2.f32 %v1253_v5 }
 0x5b1   :  { %v1504_v4 = vpop.eup %1503 }
 0x5b2   :  { %v471_v14 = vsel %vm219_vm1, %v1504_v4, %v1502_v2  ;;  %v1506_v6 = vpop.eup %1505 }
 0x5b3   :  { %474 = vrot.lane.b32.xlu0 %v471_v14, %s1588_s21  ;;  %v462_v16 = vadd.f32 1.0, %v1506_v6 }
 0x5b5   :  { %1507 = vrcp.f32 %v462_v16 }
 0x5bf   :  { %v1508_v21 = vpop.eup %1507 }
 0x5c0   :  { %v472_v23 = vmul.f32 %v1508_v21, %v371_v50 }
 0x625   :  { %v475_v24 = vpop.permute.xlu0 %474 }
 0x626   :  { %v477_v26 = vmul.f32 %v1508_v21, %v475_v24 }
 0x628   :  { %479 = vrot.lane.b32.xlu1 %v477_v26, %s1588_s21 }
 0x69a   :  { %v480_v27 = vpop.permute.xlu1 %479 }
 0x69b   :  { %v482_v28 = vadd.f32 %v480_v27, %v472_v23 }
 0x69d   :  { %1509 = vtanh.f32 %v482_v28 }
 0x6a7   :  { %v1510_v29 = vpop.eup %1509 }
 0x6a8   :  { %485 = vrot.lane.b32.xlu0 %v1510_v29, %s1588_s21 }
 0x71a   :  { %v486_v30 = vpop.permute.xlu0 %485 }
 0x71b   :  { %v488_v31 = vmul.f32 %v486_v30, %v471_v14 }
 0x71d   :  { %1255 = vmatmul.mubr.msk.f32.vlgmr.msra.gmra.mrb[2].mxu0 %vm264_vm3, %v488_v31 }
 0x71e   :  { %1358 = vmatpush1.bf16.msra.mxu0 %v1667_v39  ;;  %669 = vmatprep.mubr.f32.mxu0 %v1587_v3 }
 0x71f   :  { %1360 = vmatprep.subr.bf16.mxu0 %v1684_v44 }
 0x722   :  { %1362 = vmatpush1.bf16.msra.mxu0 %v1690_v46 }
 0x723   :  { %1364 = vmatprep.subr.bf16.mxu0 %v1700_v49 }
 0x726   :  { %1366 = vmatpush1.bf16.msra.mxu0 %v1722_v55 }
 0x727   :  { %1368 = vmatprep.subr.bf16.mxu0 %v1725_v56 }
 0x72a   :  { %1370 = vmatpush1.bf16.msra.mxu0 %v1741_v60 }
 0x72b   :  { %1372 = vmatprep.subr.bf16.mxu0 %v1659_v36 }
 0x7f0   :  { %v560_v34 = vpop.f32.mrb[2].mxu0 }
 0x7f1   :  { %v565_v35 = vadd.f32 %v560_v34, %v171_v32  ;;  %v562_v37 = vpop.f32.mrb[3].mxu0  ;;  %v183_v34 = vadd.f32 %v1782_v11, %v1643_v25 }
 0x7f2   :  { %v566_v38 = vadd.f32 %v562_v37, %v173_v33 }
 0x7f3   :  { %v1256_v7 = vmul.f32 -1.442695, %v565_v35  ;;  %v185_v35 = vadd.f32 %v1784_v13, %v1628_v12 }
 0x7f4   :  { %v1257_v40 = vmul.f32 -1.442695, %v566_v38 }
 0x7f6   :  { %1511 = vpow2.f32 %v1257_v40 }
 0x7f7   :  { %1513 = vtanh.f32 %v566_v38 }
 0x800   :  { %v1512_v41 = vpop.eup %1511 }
 0x801   :  { %v574_v42 = vadd.f32 1.0, %v1512_v41  ;;  %v1514_v43 = vpop.eup %1513 }
 0x803   :  { %1515 = vrcp.f32 %v574_v42 }
 0x804   :  { %1517 = vpow2.f32 %v1256_v7 }
 0x80d   :  { %v1516_v45 = vpop.eup %1515 }
 0x80e   :  { %v582_v47 = vsel %vm219_vm1, %v1516_v45, %v1514_v43  ;;  %v1518_v8 = vpop.eup %1517 }
 0x80f   :  { %585 = vrot.lane.b32.xlu1 %v582_v47, %s1588_s21  ;;  %v573_v48 = vadd.f32 1.0, %v1518_v8 }
 0x811   :  { %1519 = vrcp.f32 %v573_v48 }
 0x81b   :  { %v1520_v50 = vpop.eup %1519 }
 0x81c   :  { %v583_v53 = vmul.f32 %v1520_v50, %v482_v28 }
 0x881   :  { %v586_v51 = vpop.permute.xlu1 %585 }
 0x882   :  { %v588_v52 = vmul.f32 %v1520_v50, %v586_v51 }
 0x884   :  { %590 = vrot.lane.b32.xlu0 %v588_v52, %s1588_s21 }
 0x8f6   :  { %v591_v54 = vpop.permute.xlu0 %590 }
 0x8f7   :  { %v593_v57 = vadd.f32 %v591_v54, %v583_v53 }
 0x8f9   :  { %1521 = vtanh.f32 %v593_v57 }
 0x903   :  { %v1522_v58 = vpop.eup %1521 }
 0x904   :  { %596 = vrot.lane.b32.xlu1 %v1522_v58, %s1588_s21 }
 0x976   :  { %v597_v59 = vpop.permute.xlu1 %596 }
 0x977   :  { %v599_v61 = vmul.f32 %v597_v59, %v582_v47 }
 0x979   :  { %1258 = vmatmul.mubr.msk.f32.vlgmr.msra.gmra.mrb[4].mxu0 %vm264_vm3, %v599_v61 }
 0x97a   :  { %1374 = vmatpush1.bf16.msra.mxu0 %v1667_v39  ;;  %780 = vmatprep.mubr.f32.mxu0 %v1587_v3 }
 0x97b   :  { %1376 = vmatprep.subr.bf16.mxu0 %v1684_v44 }
 0x97e   :  { %1378 = vmatpush1.bf16.msra.mxu0 %v1690_v46 }
 0x97f   :  { %1380 = vmatprep.subr.bf16.mxu0 %v1700_v49 }
 0x982   :  { %1382 = vmatpush1.bf16.msra.mxu0 %v1722_v55 }
 0x983   :  { %1384 = vmatprep.subr.bf16.mxu0 %v1725_v56 }
 0x986   :  { %1386 = vmatpush1.bf16.msra.mxu0 %v1741_v60 }
 0x987   :  { %1388 = vmatprep.subr.bf16.mxu0 %v1659_v36 }
 0xa4c   :  { %v671_v0 = vpop.f32.mrb[4].mxu0 }
 0xa4d   :  { %v676_v1 = vadd.f32 %v671_v0, %v177_v62  ;;  %v673_v2 = vpop.f32.mrb[5].mxu0  ;;  %v189_v62 = vadd.f32 %v1787_v15, %v1643_v25 }
 0xa4e   :  { %v677_v4 = vadd.f32 %v673_v2, %v179_v63  ;;  %v191_v63 = vadd.f32 %v1790_v17, %v1628_v12 }
 0xa4f   :  { %v1259_v9 = vmul.f32 -1.442695, %v676_v1 }
 0xa50   :  { %v1260_v14 = vmul.f32 -1.442695, %v677_v4 }
 0xa52   :  { %1523 = vpow2.f32 %v1260_v14 }
 0xa53   :  { %1525 = vtanh.f32 %v677_v4 }
 0xa5c   :  { %v1524_v5 = vpop.eup %1523 }
 0xa5d   :  { %v685_v6 = vadd.f32 1.0, %v1524_v5  ;;  %v1526_v16 = vpop.eup %1525 }
 0xa5f   :  { %1527 = vrcp.f32 %v685_v6 }
 0xa60   :  { %1529 = vpow2.f32 %v1259_v9 }
 0xa69   :  { %v1528_v21 = vpop.eup %1527 }
 0xa6a   :  { %v693_v36 = vsel %vm219_vm1, %v1528_v21, %v1526_v16  ;;  %v1530_v10 = vpop.eup %1529 }
 0xa6b   :  { %696 = vrot.lane.b32.xlu0 %v693_v36, %s1588_s21  ;;  %v684_v24 = vadd.f32 1.0, %v1530_v10 }
 0xa6d   :  { %1531 = vrcp.f32 %v684_v24 }
 0xa77   :  { %v1532_v26 = vpop.eup %1531 }
 0xa78   :  { %v694_v28 = vmul.f32 %v1532_v26, %v593_v57 }
 0xadd   :  { %v697_v23 = vpop.permute.xlu0 %696 }
 0xade   :  { %v699_v27 = vmul.f32 %v1532_v26, %v697_v23 }
 0xae0   :  { %701 = vrot.lane.b32.xlu1 %v699_v27, %s1588_s21 }
 0xb52   :  { %v702_v29 = vpop.permute.xlu1 %701 }
 0xb53   :  { %v704_v30 = vadd.f32 %v702_v29, %v694_v28 }
 0xb55   :  { %1533 = vtanh.f32 %v704_v30 }
 0xb5f   :  { %v1534_v31 = vpop.eup %1533 }
 0xb60   :  { %707 = vrot.lane.b32.xlu0 %v1534_v31, %s1588_s21 }
 0xbd2   :  { %v708_v32 = vpop.permute.xlu0 %707 }
 0xbd3   :  { %v710_v33 = vmul.f32 %v708_v32, %v693_v36  ;;  %v197_v32 = vadd.f32 %v1796_v22, %v1628_v12 }
 0xbd5   :  { %1261 = vmatmul.mubr.msk.f32.vlgmr.msra.gmra.mrb[6].mxu0 %vm264_vm3, %v710_v33 }
 0xbd6   :  { %1390 = vmatpush1.bf16.msra.mxu0 %v1667_v39  ;;  %891 = vmatprep.mubr.f32.mxu0 %v1587_v3 }
 0xbd7   :  { %1392 = vmatprep.subr.bf16.mxu0 %v1684_v44 }
 0xbda   :  { %1394 = vmatpush1.bf16.msra.mxu0 %v1690_v46 }
 0xbdb   :  { %1396 = vmatprep.subr.bf16.mxu0 %v1700_v49 }
 0xbde   :  { %1398 = vmatpush1.bf16.msra.mxu0 %v1722_v55 }
 0xbdf   :  { %1400 = vmatprep.subr.bf16.mxu0 %v1725_v56 }
 0xbe2   :  { %1402 = vmatpush1.bf16.msra.mxu0 %v1741_v60 }
 0xca8   :  { %v782_v37 = vpop.f32.mrb[6].mxu0 }
 0xca9   :  { %v787_v38 = vadd.f32 %v782_v37, %v183_v34  ;;  %v784_v40 = vpop.f32.mrb[7].mxu0 }
 0xcaa   :  { %v788_v41 = vadd.f32 %v784_v40, %v185_v35 }
 0xcab   :  { %v1262_v11 = vmul.f32 -1.442695, %v787_v38 }
 0xcac   :  { %v1263_v42 = vmul.f32 -1.442695, %v788_v41 }
 0xcae   :  { %1535 = vpow2.f32 %v1263_v42 }
 0xcaf   :  { %1537 = vtanh.f32 %v788_v41 }
 0xcb8   :  { %v1536_v43 = vpop.eup %1535 }
 0xcb9   :  { %v796_v45 = vadd.f32 1.0, %v1536_v43  ;;  %v1538_v47 = vpop.eup %1537 }
 0xcbb   :  { %1539 = vrcp.f32 %v796_v45 }
 0xcbc   :  { %1541 = vpow2.f32 %v1262_v11 }
 0xcc5   :  { %v1540_v7 = vpop.eup %1539 }
 0xcc6   :  { %v804_v8 = vsel %vm219_vm1, %v1540_v7, %v1538_v47  ;;  %v1542_v13 = vpop.eup %1541 }
 0xcc7   :  { %807 = vrot.lane.b32.xlu1 %v804_v8, %s1588_s21  ;;  %v795_v48 = vadd.f32 1.0, %v1542_v13 }
 0xcc9   :  { %1543 = vrcp.f32 %v795_v48 }
 0xcd3   :  { %v1544_v50 = vpop.eup %1543 }
 0xcd4   :  { %v805_v53 = vmul.f32 %v1544_v50, %v704_v30 }
 0xd39   :  { %v808_v51 = vpop.permute.xlu1 %807 }
 0xd3a   :  { %v810_v52 = vmul.f32 %v1544_v50, %v808_v51 }
 0xd3c   :  { %812 = vrot.lane.b32.xlu0 %v810_v52, %s1588_s21 }
 0xdae   :  { %v813_v54 = vpop.permute.xlu0 %812 }
 0xdaf   :  { %v815_v57 = vadd.f32 %v813_v54, %v805_v53 }
 0xdb1   :  { %1545 = vtanh.f32 %v815_v57 }
 0xdbb   :  { %v1546_v58 = vpop.eup %1545 }
 0xdbc   :  { %818 = vrot.lane.b32.xlu1 %v1546_v58, %s1588_s21 }
 0xe2e   :  { %v819_v59 = vpop.permute.xlu1 %818 }
 0xe2f   :  { %v821_v61 = vmul.f32 %v819_v59, %v804_v8 }
 0xe31   :  { %1264 = vmatmul.mubr.msk.f32.vlgmr.msra.gmra.mrb[8].mxu0 %vm264_vm3, %v821_v61 }
 0xf04   :  { %v893_v0 = vpop.f32.mrb[8].mxu0 }
 0xf05   :  { %v898_v1 = vadd.f32 %v893_v0, %v189_v62  ;;  %v895_v2 = vpop.f32.mrb[9].mxu0 }
 0xf06   :  { %v899_v4 = vadd.f32 %v895_v2, %v191_v63  ;;  %v35_v2 = vld [vmem:[%s1961_s1 + $0xd0] sm:$0xff] }
 0xf07   :  { %v1265_v15 = vmul.f32 -1.442695, %v898_v1  ;;  %v33_v1 = vld [vmem:[%s1961_s1 + $0xb0] sm:$0xff] }
 0xf08   :  { %v1266_v14 = vmul.f32 -1.442695, %v899_v4 }
 0xf0a   :  { %1547 = vpow2.f32 %v1266_v14  ;;  %v1436_v14 = vpack.c.bf16 %v34_v20, %v33_v1 }
 0xf0b   :  { %1549 = vtanh.f32 %v899_v4  ;;  %v1589_v4 = vmov 0.0|0.0  }
 0xf14   :  { %v1548_v5 = vpop.eup %1547 }
 0xf15   :  { %v907_v6 = vadd.f32 1.0, %v1548_v5  ;;  %v1550_v16 = vpop.eup %1549  ;;  %v36_v5 = vld [vmem:[%s1961_s1 + $0xe0] sm:$0xff] }
 0xf17   :  { %1551 = vrcp.f32 %v907_v6  ;;  %v1439_v6 = vpack.c.bf16 %v36_v5, %v35_v2 }
 0xf18   :  { %1553 = vpow2.f32 %v1265_v15  ;;  %v39_v15 = vld [vmem:[%s1961_s1 + $0x110] sm:$0xff] }
 0xf21   :  { %v1552_v21 = vpop.eup %1551 }
 0xf22   :  { %v915_v36 = vsel %vm219_vm1, %v1552_v21, %v1550_v16  ;;  %v1554_v17 = vpop.eup %1553  ;;  %v37_v16 = vld [vmem:[%s1961_s1 + $0xf0] sm:$0xff]  ;;  %v38_v21 = vld [vmem:[%s1961_s1 + $0x100] sm:$0xff] }
 0xf23   :  { %918 = vrot.lane.b32.xlu0 %v915_v36, %s1588_s21  ;;  %v906_v9 = vadd.f32 1.0, %v1554_v17  ;;  %v40_v17 = vld [vmem:[%s1961_s1 + $0x120] sm:$0xff] }
 0xf25   :  { %1555 = vrcp.f32 %v906_v9 }
 0xf2f   :  { %v1556_v10 = vpop.eup %1555 }
 0xf30   :  { %v916_v23 = vmul.f32 %v1556_v10, %v815_v57 }
 0xf95   :  { %v919_v24 = vpop.permute.xlu0 %918 }
 0xf96   :  { %v921_v26 = vmul.f32 %v1556_v10, %v919_v24  ;;  %v1445_v10 = vpack.c.bf16 %v40_v17, %v39_v15 }
 0xf98   :  { %923 = vrot.lane.b32.xlu1 %v921_v26, %s1588_s21 }
0x100a   :  { %v924_v27 = vpop.permute.xlu1 %923 }
0x100b   :  { %v926_v28 = vadd.f32 %v924_v27, %v916_v23 }
0x100d   :  { %1557 = vtanh.f32 %v926_v28 }
0x1017   :  { %v1558_v29 = vpop.eup %1557 }
0x1018   :  { %929 = vrot.lane.b32.xlu0 %v1558_v29, %s1588_s21 }
0x108a   :  { %v930_v30 = vpop.permute.xlu0 %929 }
0x108b   :  { %v932_v31 = vmul.f32 %v930_v30, %v915_v36  ;;  %v1442_v36 = vpack.c.bf16 %v38_v21, %v37_v16  ;;  %v41_v30 = vld [vmem:[%s1961_s1 + $0x130] ss:$0 sm:$0xff] }
0x108d   :  { %1267 = vmatmul.mubr.msk.f32.vlgmr.msra.gmra.mrb[16].mxu1 %vm264_vm3, %v932_v31 }
0x108e   :  { %1422 = vmatpush1.bf16.msra.mxu1 %v1667_v39  ;;  %1111 = vmatprep.mubr.f32.mxu1 %v1587_v3 }
0x108f   :  { %1424 = vmatprep.subr.bf16.mxu1 %v1684_v44 }
0x1092   :  { %1426 = vmatpush1.bf16.msra.mxu1 %v1690_v46 }
0x1093   :  { %1428 = vmatprep.subr.bf16.mxu1 %v1700_v49 }
0x1096   :  { %1430 = vmatpush1.bf16.msra.mxu1 %v1722_v55 }
0x1097   :  { %1432 = vmatprep.subr.bf16.mxu1 %v1725_v56  ;;  %v195_v56 = vadd.f32 %v1792_v18, %v1643_v25 }
0x109a   :  { %1434 = vmatpush1.bf16.msra.mxu1 %v1741_v60 }
0x109b   :  { %1435 = vmatprep.subr.bf16.mxu1 %v1589_v4 }
0x1160   :  { %v1004_v33 = vpop.f32.mrb[16].mxu1 }
0x1161   :  { %v1006_v34 = vpop.f32.mrb[17].mxu1  ;;  %v1009_v12 = vadd.f32 %v1004_v33, %v195_v56 }
0x1162   :  { %v1010_v39 = vadd.f32 %v1006_v34, %v197_v32 }
0x1163   :  { %v1268_v60 = vmul.f32 -1.442695, %v1009_v12 }
0x1164   :  { %v1269_v35 = vmul.f32 -1.442695, %v1010_v39 }
0x1166   :  { %1559 = vpow2.f32 %v1269_v35 }
0x1167   :  { %1561 = vtanh.f32 %v1010_v39 }
0x1170   :  { %v1560_v37 = vpop.eup %1559 }
0x1171   :  { %v1018_v44 = vadd.f32 1.0, %v1560_v37  ;;  %v1562_v46 = vpop.eup %1561 }
0x1173   :  { %1563 = vrcp.f32 %v1018_v44 }
0x1174   :  { %1565 = vpow2.f32 %v1268_v60 }
0x117d   :  { %v1564_v49 = vpop.eup %1563 }
0x117e   :  { %v1026_v55 = vsel %vm219_vm1, %v1564_v49, %v1562_v46  ;;  %v1566_v22 = vpop.eup %1565 }
0x117f   :  { %1029 = vrot.lane.b32.xlu1 %v1026_v55, %s1588_s21  ;;  %v1017_v38 = vadd.f32 1.0, %v1566_v22 }
0x1181   :  { %1567 = vrcp.f32 %v1017_v38 }
0x118b   :  { %v1568_v40 = vpop.eup %1567 }
0x118c   :  { %v1027_v43 = vmul.f32 %v1568_v40, %v926_v28 }
0x11f1   :  { %v1030_v41 = vpop.permute.xlu1 %1029 }
0x11f2   :  { %v1032_v42 = vmul.f32 %v1568_v40, %v1030_v41 }
0x11f4   :  { %1034 = vrot.lane.b32.xlu0 %v1032_v42, %s1588_s21 }
0x1266   :  { %v1035_v45 = vpop.permute.xlu0 %1034 }
0x1267   :  { %v1037_v47 = vadd.f32 %v1035_v45, %v1027_v43 }
0x1269   :  { %1569 = vtanh.f32 %v1037_v47 }
0x1273   :  { %v1570_v7 = vpop.eup %1569 }
0x1274   :  { %1040 = vrot.lane.b32.xlu1 %v1570_v7, %s1588_s21 }
0x12e6   :  { %v1041_v8 = vpop.permute.xlu1 %1040 }
0x12e7   :  { %v1043_v25 = vmul.f32 %v1041_v8, %v1026_v55 }
0x12e9   :  { %1270 = vmatmul.mubr.msk.f32.vlgmr.msra.gmra.mrb[18].mxu1 %vm264_vm3, %v1043_v25 }
0x12ea   :  { %1437 = vmatpush3.bf16.msra.mxu1 %v1436_v14  ;;  %1300 = vmatprep.mubr.msk.f32.mxu1 %vm1590_vm4, %v1587_v3 }
0x12eb   :  { %1438 = vmatprep.subr.bf16.mxu1 %v1589_v4 }
0x12ee   :  { %1440 = vmatpush3.bf16.msra.mxu1 %v1439_v6 }
0x12ef   :  { %1441 = vmatprep.subr.bf16.mxu1 %v1589_v4 }
0x12f2   :  { %1443 = vmatpush3.bf16.msra.mxu1 %v1442_v36 }
0x12f3   :  { %1444 = vmatprep.subr.bf16.mxu1 %v1589_v4 }
0x12f6   :  { %1446 = vmatpush3.bf16.msra.mxu1 %v1445_v10 }
0x13bc   :  { %v1113_v18 = vpop.f32.mrb[18].mxu1 }
0x13bd   :  { %v1115_v11 = vpop.f32.mrb[19].mxu1  ;;  %v1118_v57 = vadd.f32 %v1113_v18, %v195_v56 }
0x13be   :  { %v1119_v13 = vadd.f32 %v1115_v11, %v197_v32 }
0x13bf   :  { %v1271_v58 = vmul.f32 -1.442695, %v1118_v57 }
0x13c0   :  { %v1272_v48 = vmul.f32 -1.442695, %v1119_v13 }
0x13c2   :  { %1571 = vpow2.f32 %v1272_v48 }
0x13c3   :  { %1573 = vtanh.f32 %v1119_v13 }
0x13cc   :  { %v1572_v50 = vpop.eup %1571 }
0x13cd   :  { %v1127_v51 = vadd.f32 1.0, %v1572_v50  ;;  %v1574_v52 = vpop.eup %1573 }
0x13cf   :  { %1575 = vrcp.f32 %v1127_v51 }
0x13d0   :  { %1577 = vpow2.f32 %v1271_v58 }
0x13d9   :  { %v1576_v53 = vpop.eup %1575 }
0x13da   :  { %v1135_v54 = vsel %vm219_vm1, %v1576_v53, %v1574_v52  ;;  %v1578_v59 = vpop.eup %1577 }
0x13db   :  { %1138 = vrot.lane.b32.xlu0 %v1135_v54, %s1588_s21  ;;  %v1126_v61 = vadd.f32 1.0, %v1578_v59 }
0x13dd   :  { %1579 = vrcp.f32 %v1126_v61 }
0x13e7   :  { %v1580_v62 = vpop.eup %1579 }
0x13e8   :  { %v1136_v9 = vmul.f32 %v1580_v62, %v1037_v47 }
0x144d   :  { %v1139_v63 = vpop.permute.xlu0 %1138 }
0x144e   :  { %v1141_v0 = vmul.f32 %v1580_v62, %v1139_v63 }
0x1450   :  { %1143 = vrot.lane.b32.xlu1 %v1141_v0, %s1588_s21 }
0x14c2   :  { %v1144_v24 = vpop.permute.xlu1 %1143 }
0x14c3   :  { %v1146_v26 = vadd.f32 %v1144_v24, %v1136_v9 }
0x14c5   :  { %1581 = vtanh.f32 %v1146_v26 }
0x14cf   :  { %v1582_v23 = vpop.eup %1581 }
0x14d0   :  { %1149 = vrot.lane.b32.xlu0 %v1582_v23, %s1588_s21 }
0x1542   :  { %v1150_v27 = vpop.permute.xlu0 %1149 }
0x1543   :  { %v1152_v28 = vmul.f32 %v1150_v27, %v1135_v54 }
0x1545   :  { %v1153_v29 = vsel %vm220_vm2, %v1043_v25, %v1152_v28 }
0x1546   :  { %1301 = vmatmul.mubr.msk.f32.vlgmr.msra.gmra.mrb[20].mxu1 %vm264_vm3, %v1153_v29 }
0x1619   :  { %v1223_v31 = vpop.f32.mrb[20].mxu1 }
0x161a   :  { %v1224_v32 = vadd.f32 %v1223_v31, %v41_v30  ;;  %v1302_v33 = vpop.f32.mrb[21].mxu1 }
0x161c   :  { %v1274_v34 = vmul.f32 -1.442695, %v1224_v32 }
0x161e   :  { %1583 = vpow2.f32 %v1274_v34 }
0x1628   :  { %v1584_v3 = vpop.eup %1583 }
0x1629   :  { %v1230_v39 = vadd.f32 1.0, %v1584_v3 }
0x162b   :  { %1585 = vrcp.f32 %v1230_v39 }
0x1635   :  { %v1586_v35 = vpop.eup %1585 }
0x1636   :  { %1233 = vst [vmem:[%s1963_s2] sm:$0xff] %v1586_v35 }

</bundles_post_ra>
